<compile_context>
chip_gen: v7x
topology: tpu7x:2x2x1
jax: 0.10.0
libtpu: 0.0.40
codegen_flags: <defaults>
</compile_context>

<pallas_src>
import functools

import jax
import jax.numpy as jnp
from jax.experimental import pallas as pl
from jax.experimental.pallas import tpu as pltpu

MIN_LOG_STD = 1e-06
LANE = 128


def _round_up(n, m):
    return ((n + m - 1) // m) * m


def _mlp_kernel(x_ref, w0_ref, b0_ref, w1_ref, b1_ref, mean_ref):
    # Layer 0: F.linear + relu. Weights already [in, hidden_pad], so x @ W.
    h = jnp.dot(x_ref[...], w0_ref[...], preferred_element_type=jnp.float32)
    h = jnp.maximum(h + b0_ref[...], 0.0)
    # Layer 1 (output): F.linear + relu (module applies nonlinear after every layer).
    out = jnp.dot(h, w1_ref[...], preferred_element_type=jnp.float32)
    out = jnp.maximum(out + b1_ref[...], 0.0)
    mean_ref[...] = out.astype(mean_ref.dtype)


@functools.partial(jax.jit, static_argnames=("block_b",))
def normal_policy_forward(x, w0, b0, w1, b1, log_std, *, block_b=512):
    """NormalPolicy forward.

    PyTorch-convention parameters:
      x       [B, in]
      w0      [hidden, in],  b0 [hidden]
      w1      [out, hidden], b1 [out]
      log_std [out]
    Returns (mean [B, out], std [out]) — the parameters of
    Independent(Normal(mean, std), 1).
    """
    B, in_size = x.shape
    hidden = w0.shape[0]
    out_size = w1.shape[0]

    # Lane-dense padding of feature dims. Zero-padded weight columns / biases
    # produce relu(0) = 0 in the padded lanes, so the real lanes are unchanged.
    hidden_p = _round_up(hidden, LANE)
    out_p = _round_up(out_size, LANE)

    # Pre-transpose (once, outside the kernel) to [in, out] layout + pad.
    w0_t = jnp.zeros((in_size, hidden_p), jnp.float32).at[:, :hidden].set(w0.T)
    b0_p = jnp.zeros((1, hidden_p), jnp.float32).at[:, :hidden].set(b0.reshape(1, -1))
    w1_t = jnp.zeros((hidden_p, out_p), jnp.float32).at[:hidden, :out_size].set(w1.T)
    b1_p = jnp.zeros((1, out_p), jnp.float32).at[:, :out_size].set(b1.reshape(1, -1))

    # Batch tiling: grid over batch; weights/biases pinned (index_map -> block 0).
    tb = min(block_b, _round_up(B, 8))        # multiple of 8 sublanes
    b_pad = _round_up(B, tb)
    if b_pad != B:
        x = jnp.pad(x, ((0, b_pad - B), (0, 0)))

    mean_padded = pl.pallas_call(
        _mlp_kernel,
        out_shape=jax.ShapeDtypeStruct((b_pad, out_p), jnp.float32),
        grid=(b_pad // tb,),
        in_specs=[
            pl.BlockSpec((tb, in_size), lambda i: (i, 0)),       # x: tiled over batch
            pl.BlockSpec((in_size, hidden_p), lambda i: (0, 0)),  # W0: resident
            pl.BlockSpec((1, hidden_p), lambda i: (0, 0)),        # b0: resident
            pl.BlockSpec((hidden_p, out_p), lambda i: (0, 0)),    # W1: resident
            pl.BlockSpec((1, out_p), lambda i: (0, 0)),           # b1: resident
        ],
        out_specs=pl.BlockSpec((tb, out_p), lambda i: (i, 0)),    # lane-dense mean slab
        compiler_params=pltpu.CompilerParams(
            dimension_semantics=("parallel",)),
    )(x, w0_t, b0_p, w1_t, b1_p)

    mean = mean_padded[:B, :out_size]
    # std does not depend on the input — keep it in plain JAX (tiny vector).
    std = jnp.exp(jnp.maximum(log_std, MIN_LOG_STD))
    return mean, std


def _linear_init(key, out_f, in_f):
    """Deterministic PyTorch-style uniform init U(-1/sqrt(fan_in), 1/sqrt(fan_in))."""
    kw, kb = jax.random.split(key)
    bound = 1.0 / jnp.sqrt(jnp.float32(in_f))
    w = jax.random.uniform(kw, (out_f, in_f), jnp.float32, -bound, bound)
    b = jax.random.uniform(kb, (out_f,), jnp.float32, -bound, bound)
    return w, b


def reference_forward(x, w0, b0, w1, b1, log_std):
    h = jnp.maximum(x @ w0.T + b0, 0.0)
    out = jnp.maximum(h @ w1.T + b1, 0.0)
    std = jnp.exp(jnp.maximum(log_std, MIN_LOG_STD))
    return out, std


if __name__ == "__main__":
    # NormalPolicy(input_size=32, output_size=16, hidden_sizes=(64,))
    input_size, hidden_size, output_size = 32, 64, 16
    batch = 8

    key = jax.random.PRNGKey(0)
    k_x, k_l0, k_l1 = jax.random.split(key, 3)

    x = jax.random.normal(k_x, (batch, input_size), jnp.float32)
    w0, b0 = _linear_init(k_l0, hidden_size, input_size)
    w1, b1 = _linear_init(k_l1, output_size, hidden_size)
    log_std = jnp.ones((output_size,), jnp.float32)  # np.ones(output_size)

    mean, std = normal_policy_forward(x, w0, b0, w1, b1, log_std)
    mean = jax.block_until_ready(mean)
    std = jax.block_until_ready(std)

    mean_ref, std_ref = reference_forward(x, w0, b0, w1, b1, log_std)
    assert jnp.allclose(mean, mean_ref, atol=1e-5, rtol=1e-5), "mean mismatch"
    assert jnp.allclose(std, std_ref, atol=1e-5, rtol=1e-5), "std mismatch"

    # TODO(synk): the Independent(Normal(mean, std), 1) distribution object and
    # update_params (autograd meta-gradient step) have no Pallas equivalent;
    # only the forward-pass parameters (mean, std) are produced.
    print("KERNEL_OK")
</pallas_src>

<mosaic_0001>
module attributes {stable_mosaic.version = 11 : i64} {
  func.func @_mlp_kernel(%arg0: i32, %arg1: memref<8x32xf32, #tpu.memory_space<vmem>>, %arg2: memref<32x128xf32, #tpu.memory_space<vmem>>, %arg3: memref<1x128xf32, #tpu.memory_space<vmem>>, %arg4: memref<128x128xf32, #tpu.memory_space<vmem>>, %arg5: memref<1x128xf32, #tpu.memory_space<vmem>>, %arg6: memref<8x128xf32, #tpu.memory_space<vmem>>) attributes {dimension_semantics = [#tpu.dimension_semantics<parallel>], iteration_bounds = array<i64: 1>, scalar_prefetch = 0 : i64, scratch_operands = 0 : i64, tpu.core_type = #tpu.core_type<tc>, window_params = [{transform_indices = @transform_0, window_bounds = array<i64: 8, 32>}, {pipeline_mode = #tpu.pipeline_mode<synchronous>, transform_indices = @transform_1, window_bounds = array<i64: 32, 128>}, {pipeline_mode = #tpu.pipeline_mode<synchronous>, transform_indices = @transform_2, window_bounds = array<i64: 1, 128>}, {pipeline_mode = #tpu.pipeline_mode<synchronous>, transform_indices = @transform_3, window_bounds = array<i64: 128, 128>}, {pipeline_mode = #tpu.pipeline_mode<synchronous>, transform_indices = @transform_4, window_bounds = array<i64: 1, 128>}, {transform_indices = @transform_5, window_bounds = array<i64: 8, 128>}]} {
    %c0 = arith.constant 0 : index
    %c0_0 = arith.constant 0 : index
    %0 = vector.load %arg1[%c0, %c0_0] : memref<8x32xf32, #tpu.memory_space<vmem>>, vector<8x32xf32>
    %c0_1 = arith.constant 0 : index
    %c0_2 = arith.constant 0 : index
    %1 = vector.load %arg2[%c0_1, %c0_2] : memref<32x128xf32, #tpu.memory_space<vmem>>, vector<32x128xf32>
    %cst = arith.constant dense<0.000000e+00> : vector<8x128xf32>
    %2 = tpu.matmul %0, %1, %cst {dimension_numbers = #tpu.dot_dimension_numbers<[1], [0], [0], [1], [0, 0, 1, 1], [], []>} : vector<8x32xf32>, vector<32x128xf32>, vector<8x128xf32> -> vector<8x128xf32>
    %c0_3 = arith.constant 0 : index
    %c0_4 = arith.constant 0 : index
    %3 = vector.load %arg3[%c0_3, %c0_4] : memref<1x128xf32, #tpu.memory_space<vmem>>, vector<1x128xf32>
    %4 = vector.broadcast %3 : vector<1x128xf32> to vector<8x128xf32>
    %5 = arith.addf %2, %4 : vector<8x128xf32>
    %cst_5 = arith.constant 0.000000e+00 : f32
    %6 = vector.broadcast %cst_5 : f32 to vector<8x128xf32>
    %7 = arith.maximumf %5, %6 : vector<8x128xf32>
    %c0_6 = arith.constant 0 : index
    %c0_7 = arith.constant 0 : index
    %8 = vector.load %arg4[%c0_6, %c0_7] : memref<128x128xf32, #tpu.memory_space<vmem>>, vector<128x128xf32>
    %cst_8 = arith.constant dense<0.000000e+00> : vector<8x128xf32>
    %9 = tpu.matmul %7, %8, %cst_8 {dimension_numbers = #tpu.dot_dimension_numbers<[1], [0], [0], [1], [0, 0, 1, 1], [], []>} : vector<8x128xf32>, vector<128x128xf32>, vector<8x128xf32> -> vector<8x128xf32>
    %c0_9 = arith.constant 0 : index
    %c0_10 = arith.constant 0 : index
    %10 = vector.load %arg5[%c0_9, %c0_10] : memref<1x128xf32, #tpu.memory_space<vmem>>, vector<1x128xf32>
    %11 = vector.broadcast %10 : vector<1x128xf32> to vector<8x128xf32>
    %12 = arith.addf %9, %11 : vector<8x128xf32>
    %cst_11 = arith.constant 0.000000e+00 : f32
    %13 = vector.broadcast %cst_11 : f32 to vector<8x128xf32>
    %14 = arith.maximumf %12, %13 : vector<8x128xf32>
    %c0_12 = arith.constant 0 : index
    %c0_13 = arith.constant 0 : index
    %15 = vector.load %arg6[%c0_12, %c0_13] : memref<8x128xf32, #tpu.memory_space<vmem>>, vector<8x128xf32>
    tpu.vector_store %arg6[%c0_12, %c0_13], %14 {strides = array<i32>} : memref<8x128xf32, #tpu.memory_space<vmem>>, vector<8x128xf32>,
    return
  }
  func.func @transform_0(%arg0: i32) -> (i32, i32) {
    %c0_i32 = arith.constant 0 : i32
    %c0_i32_0 = arith.constant 0 : i32
    return %arg0, %c0_i32 : i32, i32
  }
  func.func @transform_1(%arg0: i32) -> (i32, i32) {
    %c0_i32 = arith.constant 0 : i32
    %c0_i32_0 = arith.constant 0 : i32
    %c0_i32_1 = arith.constant 0 : i32
    return %c0_i32, %c0_i32_0 : i32, i32
  }
  func.func @transform_2(%arg0: i32) -> (i32, i32) {
    %c0_i32 = arith.constant 0 : i32
    %c0_i32_0 = arith.constant 0 : i32
    %c0_i32_1 = arith.constant 0 : i32
    return %c0_i32, %c0_i32_0 : i32, i32
  }
  func.func @transform_3(%arg0: i32) -> (i32, i32) {
    %c0_i32 = arith.constant 0 : i32
    %c0_i32_0 = arith.constant 0 : i32
    %c0_i32_1 = arith.constant 0 : i32
    return %c0_i32, %c0_i32_0 : i32, i32
  }
  func.func @transform_4(%arg0: i32) -> (i32, i32) {
    %c0_i32 = arith.constant 0 : i32
    %c0_i32_0 = arith.constant 0 : i32
    %c0_i32_1 = arith.constant 0 : i32
    return %c0_i32, %c0_i32_0 : i32, i32
  }
  func.func @transform_5(%arg0: i32) -> (i32, i32) {
    %c0_i32 = arith.constant 0 : i32
    %c0_i32_0 = arith.constant 0 : i32
    return %arg0, %c0_i32 : i32, i32
  }
}

</mosaic_0001>

<bundles_post_ra>
// kernel: normal_policy_forward.1
= control target key start
LH: loop header
LB: loop body
LE: loop exit
PB: predicated region body
PF: predicated region fallthrough
CT: control target
= control target key end

     0   :  { %v346_v3 = vmov 0.0|0.0   ;;  %vm347_vm0 = vmmov 0   ;;  %v348_v6 = vmov 0.0   ;;  %s461_s0 = inlined_call_operand.vmem [shape: f32[8,32], index: 0, kind: input, shape index: {}]   ;;  %s462_s1 = inlined_call_operand.vmem [shape: f32[32,128], index: 1, kind: input, shape index: {}]   ;;  %s463_s2 = inlined_call_operand.vmem [shape: f32[1,128], index: 2, kind: input, shape index: {}]   ;;  %s464_s3 = inlined_call_operand.vmem [shape: f32[128,128], index: 3, kind: input, shape index: {}]   ;;  %s465_s4 = inlined_call_operand.vmem [shape: f32[1,128], index: 4, kind: input, shape index: {}]   ;;  %s466_s5 = inlined_call_operand.hbm [shape: f32[8,128], index: 5, kind: output, shape index: {}]  }
   0x1   :  { %v22_v0 = vld [vmem:[%s462_s1] sm:$0xff]  ;;  %v23_v1 = vld [vmem:[%s462_s1 + $0x8] sm:$0xff]  ;;  %v24_v2 = vld [vmem:[%s462_s1 + $0x10] sm:$0xff]  ;;  %288 = vmatprep.subr.bf16.mxu0 %v346_v3  ;;  %250 = vmatprep.mubr.msk.f32.mxu0 %vm347_vm0, %v348_v6 }
   0x2   :  { %v289_v4 = vpack.c.bf16 %v23_v1, %v22_v0  ;;  %v25_v5 = vld [vmem:[%s462_s1 + $0x18] sm:$0xff]  ;;  %v108_v7 = vld [vmem:[%s464_s3] sm:$0xff]  ;;  %294 = vmatprep.subr.bf16.mxu1 %v346_v3  ;;  %v109_v8 = vld [vmem:[%s464_s3 + $0x8] sm:$0xff]  ;;  %285 = vmatprep.mubr.msk.f32.mxu1 %vm347_vm0, %v348_v6 }
   0x3   :  { %v110_v9 = vld [vmem:[%s464_s3 + $0x10] sm:$0xff]  ;;  %v111_v10 = vld [vmem:[%s464_s3 + $0x18] sm:$0xff]  ;;  %v292_v11 = vpack.c.bf16 %v25_v5, %v24_v2  ;;  %v295_v12 = vpack.c.bf16 %v109_v8, %v108_v7  ;;  %v112_v14 = vld [vmem:[%s464_s3 + $0x20] sm:$0xff] }
   0x4   :  { %290 = vmatpush3.bf16.msra.mxu0 %v289_v4  ;;  %v298_v13 = vpack.c.bf16 %v111_v10, %v110_v9  ;;  %v113_v15 = vld [vmem:[%s464_s3 + $0x28] sm:$0xff] }
   0x5   :  { %291 = vmatprep.subr.bf16.mxu0 %v346_v3  ;;  %296 = vmatpush3.bf16.msra.mxu1 %v295_v12 }
   0x6   :  { %297 = vmatprep.subr.bf16.mxu1 %v346_v3 }
   0x7   :  { %10 = vsyncpa [#allocation3], 0  ;;  %v21_v16 = vld [vmem:[%s461_s0] sm:$0xff]  ;;  %vm33_vm1 = vcmask 261120   ;;  %v301_v17 = vpack.c.bf16 %v113_v15, %v112_v14  ;;  %v114_v18 = vld [vmem:[%s464_s3 + $0x30] sm:$0xff]  ;;  %s349_s11 = smov [#allocation2]  }
   0x8   :  { %293 = vmatpush3.bf16.msra.mxu0 %v292_v11  ;;  %v115_v19 = vld [vmem:[%s464_s3 + $0x38] sm:$0xff]  ;;  %v116_v21 = vld [vmem:[%s464_s3 + $0x40] sm:$0xff]  ;;  %v117_v22 = vld [vmem:[%s464_s3 + $0x48] sm:$0xff]  ;;  %s209_s12 = sshll.u32 %s349_s11, 4  ;;  %s210_s12 = int_to_ptr.vmem [resolvable:$true] %s209_s12 }
   0x9   :  { %299 = vmatpush3.bf16.msra.mxu1 %v298_v13  ;;  %v304_v20 = vpack.c.bf16 %v115_v19, %v114_v18  ;;  %v307_v23 = vpack.c.bf16 %v117_v22, %v116_v21  ;;  %v118_v24 = vld [vmem:[%s464_s3 + $0x50] sm:$0xff]  ;;  %v119_v25 = vld [vmem:[%s464_s3 + $0x58] sm:$0xff]  ;;  %v120_v27 = vld [vmem:[%s464_s3 + $0x60] sm:$0xff]  ;;  %p327_p1 = scmp.lt.s32.totalorder %s210_s12, %s210_s12 }
   0xa   :  { %300 = vmatprep.subr.bf16.mxu1 %v346_v3  ;;  %v310_v26 = vpack.c.bf16 %v119_v25, %v118_v24  ;;  %v121_v28 = vld [vmem:[%s464_s3 + $0x68] sm:$0xff]  ;;  %v122_v30 = vld [vmem:[%s464_s3 + $0x70] sm:$0xff]  ;;  %v123_v31 = vld [vmem:[%s464_s3 + $0x78] sm:$0xff]  ;;  %s322_s3 = scalar_lea.vmem %s210_s12, 128 }
   0xb   :  { %251 = vmatmul.mubr.msk.f32.vlgmr.msra.gmra.mrb[0].mxu0 %vm33_vm1, %v21_v16  ;;  %v313_v29 = vpack.c.bf16 %v121_v28, %v120_v27  ;;  %v316_v32 = vpack.c.bf16 %v123_v31, %v122_v30  ;;  %v217_v33 = vld [vmem:[%s463_s2] ss:$0 sm:$0xff]  ;;  %p323_p0 = scmp.ne.s32.totalorder %s210_s12, %s322_s3  ;;  %p328_p2 = scmp.lt.s32.totalorder %s322_s3, %s322_s3 }
   0xc   :  { %v219_v38 = vld [vmem:[%s465_s4] ss:$0 sm:$0xff] }
   0xd   :  { %302 = vmatpush3.bf16.msra.mxu1 %v301_v17  ;;  %p329_p3 = por %p328_p2, %p327_p1 }
   0xe   :  { %303 = vmatprep.subr.bf16.mxu1 %v346_v3 }
   0xf   :  { %p330_p4 = pnand %p329_p3, %p323_p0 }
  0x11   :  { %305 = vmatpush3.bf16.msra.mxu1 %v304_v20 }
  0x12   :  { %306 = vmatprep.subr.bf16.mxu1 %v346_v3 }
  0x15   :  { %308 = vmatpush3.bf16.msra.mxu1 %v307_v23 }
  0x16   :  { %309 = vmatprep.subr.bf16.mxu1 %v346_v3 }
  0x19   :  { %311 = vmatpush3.bf16.msra.mxu1 %v310_v26 }
  0x1a   :  { %312 = vmatprep.subr.bf16.mxu1 %v346_v3 }
  0x1d   :  { %314 = vmatpush3.bf16.msra.mxu1 %v313_v29 }
  0x1e   :  { %315 = vmatprep.subr.bf16.mxu1 %v346_v3 }
  0x21   :  { %317 = vmatpush3.bf16.msra.mxu1 %v316_v32 }
  0xde   :  { %v103_v34 = vpop.f32.mrb[0].mxu0 }
  0xdf   :  { %v104_v35 = vadd.f32 %v217_v33, %v103_v34  ;;  %v252_v36 = vpop.f32.mrb[1].mxu0 }
  0xe1   :  { %v107_v37 = vmax.f32 %v104_v35, 0.0 }
  0xe3   :  { %286 = vmatmul.mubr.f32.vlgmr.msra.gmra.mrb[0].mxu1 %v107_v37 }
 0x1b6   :  { %v197_v39 = vpop.f32.mrb[0].mxu1 }
 0x1b7   :  { %v198_v40 = vadd.f32 %v219_v38, %v197_v39  ;;  %v287_v41 = vpop.f32.mrb[1].mxu1 }
 0x1b9   :  { %v201_v42 = vmax.f32 %v198_v40, 0.0 }
 0x1bb   :  { %202 = vst [vmem:[#allocation2] sm:$0xff] %v201_v42 }
 0x1bc   :  { %333 = shalt.err (!%p330_p4)
}
 0x1bd   :  { %s334_s14 = scalar_lea.hbm %s466_s5, 128 }
 0x1be   :  { %p335_p5 = scmp.ne.s32.totalorder %s466_s5, %s334_s14  ;;  %p338_p6 = scmp.lt.u32.totalorder %s334_s14, %s466_s5 }
 0x1c0   :  { %p340_p7 = pnand %p338_p6, %p335_p5 }
 0x1c2   :  { %343 = shalt.err (!%p340_p7)
}
 0x1c3   :  { %212 = dma.vmem_to_hbm [thread:$0]  %s210_s12, 128, %s466_s5, [#allocation3]  }
 0x1c4   :  { %344 = dma.done.wait [#allocation3], 128  }
 0x1c5   :  { %345 = vsyncadd [#allocation3], 4294967168 }
 0x1c6   :  { %216 = vsyncpa [#allocation3], 1 }

</bundles_post_ra>
